<compile_context>
chip_gen: v7x
topology: tpu7x:2x2x1
jax: 0.10.0
libtpu: 0.0.40
codegen_flags: <defaults>
</compile_context>

<pallas_src>
import functools

import jax
import jax.numpy as jnp
from jax.experimental import pallas as pl
from jax.experimental.pallas import tpu as pltpu

INPUT_SIZE = 3
OUTPUT_SIZE = 3


def _round_up(x: int, m: int) -> int:
    return ((x + m - 1) // m) * m


def _vmem_capacity_bytes() -> int:
    try:
        info = pltpu.get_tpu_info()
        cap = int(getattr(info, "vmem_capacity_bytes", 0))
        if cap > 0:
            return cap
    except Exception:
        pass
    return 64 * 1024 * 1024  # conservative default: v7x per-TensorCore VMEM


def _linear_kernel_single(x_ref, w_ref, b_ref, o_ref, *, precision):
    # Whole K reduction in one MXU call: y = x @ W^T + b. No accumulator scratch,
    # no zero-init pass, no acc->out copy pass.
    acc = jnp.dot(x_ref[...], w_ref[...],
                  preferred_element_type=jnp.float32, precision=precision)
    o_ref[...] = (acc + b_ref[...].astype(jnp.float32)).astype(o_ref.dtype)


def _linear_kernel_multik(x_ref, w_ref, b_ref, o_ref, acc_ref, *, precision):
    # K-tiled reduction with a resident f32 accumulator; bias added once on the last step.
    k = pl.program_id(2)

    @pl.when(k == 0)
    def _():
        acc_ref[...] = jnp.zeros_like(acc_ref)

    acc_ref[...] += jnp.dot(x_ref[...], w_ref[...],
                            preferred_element_type=jnp.float32, precision=precision)

    @pl.when(k == pl.num_programs(2) - 1)
    def _():
        o_ref[...] = (acc_ref[...] + b_ref[...].astype(jnp.float32)).astype(o_ref.dtype)


def dense_layer(x, w_t, bias, *, tm=None, tn=None, tk=None,
                weight_resident=None, buffer_depth=None, force_pallas=False):
    """nn.Linear forward: y = x @ w_t + bias.

    w_t is the PyTorch weight already transposed to [K, N] (hoisted once at
    parameter-prep time so the kernel RHS is lane-dense and no per-call
    transpose/relayout HBM passes are paid).
    """
    orig_leading = x.shape[:-1]
    K = x.shape[-1]
    if x.ndim != 2:
        x = x.reshape(-1, K)
    M = x.shape[0]
    Kw, N = w_t.shape
    assert K == Kw and bias.shape == (N,)

    dtype = x.dtype
    itemsize = jnp.dtype(dtype).itemsize
    is_f32 = dtype == jnp.float32
    precision = jax.lax.Precision.HIGHEST if is_f32 else None

    # Tiny-problem fallback: at the spec size (2x3x3) a kernel is >99% padded FLOPs plus
    # launch/DMA overhead -- plain XLA fusion is strictly faster.
    if not force_pallas and (M * K < 8 * 128 and K * N < 8 * 128):
        out = jnp.dot(x, w_t, precision=precision) + bias
        return out.reshape(*orig_leading, N)

    vmem_cap = _vmem_capacity_bytes()
    vmem_budget = (vmem_cap * 3) // 4  # headroom for compiler scratch / buffer overshoot

    Kp_min = _round_up(K, 128)
    Np_min = _round_up(N, 128)

    # Weight-resident fast path decision: keep the whole padded W^T in VMEM, fetch it once.
    w_bytes = Kp_min * Np_min * itemsize
    if weight_resident is None:
        weight_resident = (2 * w_bytes) <= min(24 * 1024 * 1024, vmem_budget // 3)

    tn_auto = tn is None
    if weight_resident:
        tk = Kp_min if tk is None else _round_up(min(tk, Kp_min), 128)
        tm = tm or min(512, _round_up(M, 8))
        if tn is None:
            tn = Np_min
    else:
        tm = tm or min(512, _round_up(M, 8))
        tn = tn or min(512, Np_min)
        tk = tk or min(1024, Kp_min)

    # v7x has 2 TensorCores sharded over the "parallel" grid axes: if M fits in a single
    # tile, split N so the parallel portion of the grid has >= 2 blocks.
    if tn_auto and _round_up(M, tm) // tm == 1 and tn >= 256 and tn % 256 == 0:
        tn //= 2

    # Shrink tiles until the double-buffered footprint fits the VMEM budget.
    def _footprint(tm_, tn_, tk_):
        return ((2 * (tm_ * tk_ + tk_ * tn_ + tn_) + 2 * tm_ * tn_) * itemsize
                + tm_ * tn_ * 4)

    while _footprint(tm, tn, tk) > vmem_budget:
        if not weight_resident and tk > 128:
            tk = max(128, _round_up(tk // 2, 128))
        elif tm > 8:
            tm = max(8, tm // 2)
        elif tn > 128:
            tn = max(128, _round_up(tn // 2, 128))
        else:
            break

    Mp = _round_up(M, tm)
    Kp = _round_up(K, tk)
    Np = _round_up(N, tn)
    kgrid = Kp // tk

    x_p = x if (Mp, Kp) == (M, K) else jnp.pad(x, ((0, Mp - M), (0, Kp - K)))
    w_p = w_t if (Kp, Np) == (K, N) else jnp.pad(w_t, ((0, Kp - K), (0, Np - N)))
    b_p = jnp.pad(bias, (0, Np - N)).reshape(1, Np)

    pipeline_mode = pl.Buffered(buffer_depth) if buffer_depth is not None else None

    if kgrid == 1:
        # Single-K path: no accumulator, no reduction phasing. With Np//tn == 1 the
        # W^T block index never changes, so the weight is DMA'd exactly once.
        grid = (Mp // tm, Np // tn)
        kernel = functools.partial(_linear_kernel_single, precision=precision)
        in_specs = [
            pl.BlockSpec((tm, Kp), lambda i, j: (i, 0)),
            pl.BlockSpec((Kp, tn), lambda i, j: (0, j)),
            pl.BlockSpec((1, tn), lambda i, j: (0, j)),
        ]
        out_spec = pl.BlockSpec((tm, tn), lambda i, j: (i, j))
        scratch_shapes = []
        dim_sem = ("parallel", "parallel")
        w_passes = 1 if Np // tn == 1 else Mp // tm
        x_passes = 1
    else:
        grid = (Mp // tm, Np // tn, Kp // tk)
        kernel = functools.partial(_linear_kernel_multik, precision=precision)
        if pipeline_mode is not None:
            x_spec = pl.BlockSpec((tm, tk), lambda i, j, k: (i, k),
                                  pipeline_mode=pipeline_mode)
            w_spec = pl.BlockSpec((tk, tn), lambda i, j, k: (k, j),
                                  pipeline_mode=pipeline_mode)
        else:
            x_spec = pl.BlockSpec((tm, tk), lambda i, j, k: (i, k))
            w_spec = pl.BlockSpec((tk, tn), lambda i, j, k: (k, j))
        in_specs = [x_spec, w_spec, pl.BlockSpec((1, tn), lambda i, j, k: (0, j))]
        out_spec = pl.BlockSpec((tm, tn), lambda i, j, k: (i, j))
        scratch_shapes = [pltpu.VMEM((tm, tn), jnp.float32)]
        dim_sem = ("parallel", "parallel", "arbitrary")
        w_passes = Mp // tm   # weight re-streamed once per M block row
        x_passes = Np // tn   # activations re-streamed once per N block col

    vmem_limit = int(min(max(2 * _footprint(tm, tn, tk), 32 * 1024 * 1024), vmem_budget))

    cost = pl.CostEstimate(
        flops=2 * Mp * Np * Kp,
        transcendentals=0,
        bytes_accessed=(x_passes * Mp * Kp + w_passes * Kp * Np + Np + Mp * Np) * itemsize,
    )

    out_p = pl.pallas_call(
        kernel,
        out_shape=jax.ShapeDtypeStruct((Mp, Np), dtype),
        grid_spec=pltpu.PrefetchScalarGridSpec(
            num_scalar_prefetch=0,
            grid=grid,
            in_specs=in_specs,
            out_specs=out_spec,
            scratch_shapes=scratch_shapes,
        ),
        compiler_params=pltpu.CompilerParams(
            dimension_semantics=dim_sem,
            vmem_limit_bytes=vmem_limit,
        ),
        cost_estimate=cost,
    )(x_p, w_p, b_p)

    return out_p[:M, :N].reshape(*orig_leading, N)


if __name__ == "__main__":
    key = jax.random.PRNGKey(0)
    kx, kw, kb, kx2, kw2, kb2 = jax.random.split(key, 6)

    # --- Spec case: DenseLayer = nn.Linear(3, 3), batch = 2 ---
    batch = 2
    x = jax.random.normal(kx, (batch, INPUT_SIZE), dtype=jnp.float32)
    bound = 1.0 / jnp.sqrt(jnp.float32(INPUT_SIZE))
    weight = jax.random.uniform(kw, (OUTPUT_SIZE, INPUT_SIZE),
                                minval=-bound, maxval=bound, dtype=jnp.float32)
    bias = jax.random.uniform(kb, (OUTPUT_SIZE,),
                              minval=-bound, maxval=bound, dtype=jnp.float32)
    w_t = weight.T  # weight transpose hoisted once, outside the forward hot path

    ref = jnp.dot(x, w_t, precision=jax.lax.Precision.HIGHEST) + bias

    out = dense_layer(x, w_t, bias, force_pallas=True)  # exercise the Pallas path
    jax.block_until_ready(out)
    assert out.shape == (batch, OUTPUT_SIZE)
    assert jnp.allclose(out, ref, atol=1e-5), "pallas path mismatch vs reference"

    out_fb = dense_layer(x, w_t, bias)  # tiny-problem fallback (production spec-size path)
    assert jnp.allclose(out_fb, ref, atol=1e-5), "fallback path mismatch vs reference"

    # --- Realistic Linear size: weight-resident single-K path and tiled multi-K path ---
    M2, K2, N2 = 256, 512, 512
    x2 = jax.random.normal(kx2, (M2, K2), dtype=jnp.float32)
    w2 = jax.random.uniform(kw2, (N2, K2), minval=-0.05, maxval=0.05, dtype=jnp.float32)
    b2 = jax.random.uniform(kb2, (N2,), minval=-0.05, maxval=0.05, dtype=jnp.float32)
    w2_t = w2.T
    ref2 = jnp.dot(x2, w2_t, precision=jax.lax.Precision.HIGHEST) + b2

    out_res = dense_layer(x2, w2_t, b2)  # weight-resident, single-K, >=2 parallel N blocks
    jax.block_until_ready(out_res)
    assert jnp.allclose(out_res, ref2, atol=1e-4, rtol=1e-5), "weight-resident path mismatch"

    out_tiled = dense_layer(x2, w2_t, b2, weight_resident=False, tk=256)  # multi-K accumulator path
    jax.block_until_ready(out_tiled)
    assert jnp.allclose(out_tiled, ref2, atol=1e-4, rtol=1e-5), "multi-K path mismatch"

    print("KERNEL_OK")
</pallas_src>

<mosaic_0001>
module attributes {stable_mosaic.version = 11 : i64} {
  func.func @_linear_kernel_single(%arg0: i32, %arg1: i32, %arg2: memref<8x128xf32, #tpu.memory_space<vmem>>, %arg3: memref<128x128xf32, #tpu.memory_space<vmem>>, %arg4: memref<1x128xf32, #tpu.memory_space<vmem>>, %arg5: memref<8x128xf32, #tpu.memory_space<vmem>>) attributes {dimension_semantics = [#tpu.dimension_semantics<parallel>, #tpu.dimension_semantics<parallel>], iteration_bounds = array<i64: 1, 1>, scalar_prefetch = 0 : i64, scratch_operands = 0 : i64, tpu.core_type = #tpu.core_type<tc>, window_params = [{transform_indices = @transform_0, window_bounds = array<i64: 8, 128>}, {transform_indices = @transform_1, window_bounds = array<i64: 128, 128>}, {transform_indices = @transform_2, window_bounds = array<i64: 1, 128>}, {transform_indices = @transform_3, window_bounds = array<i64: 8, 128>}]} {
    %c0 = arith.constant 0 : index
    %c0_0 = arith.constant 0 : index
    %0 = vector.load %arg2[%c0, %c0_0] : memref<8x128xf32, #tpu.memory_space<vmem>>, vector<8x128xf32>
    %c0_1 = arith.constant 0 : index
    %c0_2 = arith.constant 0 : index
    %1 = vector.load %arg3[%c0_1, %c0_2] : memref<128x128xf32, #tpu.memory_space<vmem>>, vector<128x128xf32>
    %cst = arith.constant dense<0.000000e+00> : vector<8x128xf32>
    %2 = tpu.matmul %0, %1, %cst {dimension_numbers = #tpu.dot_dimension_numbers<[1], [0], [0], [1], [0, 0, 1, 1], [], []>, precision = #tpu.contract_precision<fp32>} : vector<8x128xf32>, vector<128x128xf32>, vector<8x128xf32> -> vector<8x128xf32>
    %c0_3 = arith.constant 0 : index
    %c0_4 = arith.constant 0 : index
    %3 = vector.load %arg4[%c0_3, %c0_4] : memref<1x128xf32, #tpu.memory_space<vmem>>, vector<1x128xf32>
    %4 = vector.broadcast %3 : vector<1x128xf32> to vector<8x128xf32>
    %5 = arith.addf %2, %4 : vector<8x128xf32>
    %c0_5 = arith.constant 0 : index
    %c0_6 = arith.constant 0 : index
    %6 = vector.load %arg5[%c0_5, %c0_6] : memref<8x128xf32, #tpu.memory_space<vmem>>, vector<8x128xf32>
    tpu.vector_store %arg5[%c0_5, %c0_6], %5 {strides = array<i32>} : memref<8x128xf32, #tpu.memory_space<vmem>>, vector<8x128xf32>,
    return
  }
  func.func @transform_0(%arg0: i32, %arg1: i32) -> (i32, i32) {
    %c0_i32 = arith.constant 0 : i32
    %c0_i32_0 = arith.constant 0 : i32
    return %arg0, %c0_i32 : i32, i32
  }
  func.func @transform_1(%arg0: i32, %arg1: i32) -> (i32, i32) {
    %c0_i32 = arith.constant 0 : i32
    %c0_i32_0 = arith.constant 0 : i32
    return %c0_i32, %arg1 : i32, i32
  }
  func.func @transform_2(%arg0: i32, %arg1: i32) -> (i32, i32) {
    %c0_i32 = arith.constant 0 : i32
    %c0_i32_0 = arith.constant 0 : i32
    return %c0_i32, %arg1 : i32, i32
  }
  func.func @transform_3(%arg0: i32, %arg1: i32) -> (i32, i32) {
    %c0_i32 = arith.constant 0 : i32
    return %arg0, %arg1 : i32, i32
  }
}

</mosaic_0001>

<bundles_post_ra>
// kernel: tpu_custom_call.1
= control target key start
LH: loop header
LB: loop body
LE: loop exit
PB: predicated region body
PF: predicated region fallthrough
CT: control target
= control target key end

     0   :  { %8 = vsyncpa [#allocation3], 0  ;;  %s1591_s0 = inlined_call_operand.hbm [shape: f32[8,128], index: 0, kind: input, shape index: {}]   ;;  %s1592_s1 = inlined_call_operand.hbm [shape: f32[128,128], index: 1, kind: input, shape index: {}]   ;;  %s1593_s2 = inlined_call_operand.vmem [shape: f32[1,128], index: 2, kind: input, shape index: {}]   ;;  %s1594_s3 = inlined_call_operand.hbm [shape: f32[8,128], index: 3, kind: output, shape index: {}]  }
   0x1   :  { %9 = vsyncpa [#allocation6], 0 }
   0x2   :  { %10 = vsyncpa [#allocation4], 0  ;;  %s1270_s12 = smov [#allocation2]   ;;  %s1271_s14 = smov [#allocation5]  }
   0x3   :  { %s17_s13 = sshll.u32 %s1270_s12, 4  ;;  %s26_s15 = sshll.u32 %s1271_s14, 4  ;;  %s18_s13 = int_to_ptr.vmem [resolvable:$true] %s17_s13  ;;  %s1298_s15 = int_to_ptr.vmem [resolvable:$true] %s26_s15 }
   0x4   :  { %s1198_s18 = scalar_lea.hbm %s1591_s0, 128 }
   0x5   :  { %p1199_p0 = scmp.ne.s32.totalorder %s1591_s0, %s1198_s18  ;;  %p1202_p1 = scmp.lt.u32.totalorder %s1198_s18, %s1591_s0 }
   0x7   :  { %p1204_p2 = pnand %p1202_p1, %p1199_p0 }
   0x9   :  { %1207 = shalt.err (!%p1204_p2)
}
   0xa   :  { %s1208_s23 = scalar_lea.vmem %s18_s13, 128  ;;  %p1213_p4 = scmp.lt.s32.totalorder %s18_s13, %s18_s13 }
   0xb   :  { %p1209_p3 = scmp.ne.s32.totalorder %s18_s13, %s1208_s23  ;;  %p1214_p5 = scmp.lt.s32.totalorder %s1208_s23, %s1208_s23 }
   0xd   :  { %p1215_p6 = por %p1214_p5, %p1213_p4 }
   0xf   :  { %p1216_p7 = pnand %p1215_p6, %p1209_p3 }
  0x11   :  { %1219 = shalt.err (!%p1216_p7)
}
  0x12   :  { %20 = dma.hbm_to_vmem [thread:$0]  %s1591_s0, 128, %s18_s13, [#allocation3]  }
  0x13   :  { %s1220_s28 = scalar_lea.hbm %s1592_s1, 2048 }
  0x14   :  { %p1221_p8 = scmp.ne.s32.totalorder %s1592_s1, %s1220_s28  ;;  %p1224_p9 = scmp.lt.u32.totalorder %s1220_s28, %s1592_s1 }
  0x16   :  { %p1226_p10 = pnand %p1224_p9, %p1221_p8 }
  0x18   :  { %1229 = shalt.err (!%p1226_p10)
}
  0x19   :  { %s1230_s6 = scalar_lea.vmem %s1298_s15, 2048  ;;  %p1235_p12 = scmp.lt.s32.totalorder %s1298_s15, %s1298_s15 }
  0x1a   :  { %p1231_p11 = scmp.ne.s32.totalorder %s1298_s15, %s1230_s6  ;;  %p1236_p13 = scmp.lt.s32.totalorder %s1230_s6, %s1230_s6 }
  0x1c   :  { %p1237_p0 = por %p1236_p13, %p1235_p12 }
  0x1e   :  { %p1238_p1 = pnand %p1237_p0, %p1231_p11 }
  0x20   :  { %1241 = shalt.err (!%p1238_p1)
}
  0x21   :  { %s1272_s0 = smov 128   ;;  %s1273_s7 = smov 8  }
  0x22   :  { %32 = dma.hbm_to_vmem [thread:$0]  %s1592_s1, 2048, %s1298_s15, [#allocation6], %s1272_s0, %s1272_s0, %s1273_s7  }
  0x23   :  { %1264 = dma.done.wait [#allocation3], 128  }
  0x24   :  { %1265 = vsyncadd [#allocation3], 4294967168 }
  0x25   :  { %1266 = dma.done.wait [#allocation6], 2048  }
  0x26   :  { %1267 = vsyncadd [#allocation6], 4294965248  ;;  %v1274_v0 = vmov 0.0|0.0   ;;  %vm1275_vm0 = vmmov 0   ;;  %v1276_v1 = vmov 0.0   ;;  %v42_v2 = vld [vmem:[#allocation5] sm:$0xff] }
  0x27   :  { %1036 = vmatprep.subr.bf16.mxu1 %v1274_v0  ;;  %1108 = vmatprep.subr.bf16.mxu0 %v1274_v0  ;;  %v43_v3 = vld [vmem:[#allocation5 + $0x8] sm:$0xff]  ;;  %v44_v4 = vld [vmem:[#allocation5 + $0x10] sm:$0xff]  ;;  %v66_v5 = vand.u32 4294901760, %v42_v2  ;;  %v45_v7 = vld [vmem:[#allocation5 + $0x18] sm:$0xff]  ;;  %s1277_s11 = smov [#allocation7]  }
  0x28   :  { %858 = vmatprep.mubr.msk.f32.mxu1 %vm1275_vm0, %v1276_v1  ;;  %963 = vmatprep.mubr.msk.f32.mxu0 %vm1275_vm0, %v1276_v1  ;;  %v69_v6 = vand.u32 4294901760, %v43_v3  ;;  %v72_v8 = vand.u32 4294901760, %v44_v4  ;;  %v75_v9 = vand.u32 4294901760, %v45_v7  ;;  %v46_v10 = vld [vmem:[#allocation5 + $0x20] sm:$0xff]  ;;  %v47_v11 = vld [vmem:[#allocation5 + $0x28] sm:$0xff]  ;;  %v48_v16 = vld [vmem:[#allocation5 + $0x30] sm:$0xff] }
  0x29   :  { %v78_v14 = vand.u32 4294901760, %v46_v10  ;;  %v81_v15 = vand.u32 4294901760, %v47_v11  ;;  %v49_v17 = vld [vmem:[#allocation5 + $0x38] sm:$0xff]  ;;  %v84_v19 = vand.u32 4294901760, %v48_v16  ;;  %v1349_v21 = vld [vmem:[#allocation5 + $0x40] sm:$0xff]  ;;  %v1351_v22 = vld [vmem:[#allocation5 + $0x48] sm:$0xff]  ;;  %v1365_v29 = vsub.f32 %v42_v2, %v66_v5 }
  0x2a   :  { %v1335_v12 = vpack.c.bf16 %v69_v6, %v66_v5  ;;  %v1339_v13 = vpack.c.bf16 %v75_v9, %v72_v8  ;;  %v87_v20 = vand.u32 4294901760, %v49_v17  ;;  %v90_v24 = vand.u32 4294901760, %v1349_v21  ;;  %v41_v26 = vld [vmem:[#allocation2] sm:$0xff]  ;;  %v1361_v27 = vld [vmem:[#allocation5 + $0x50] sm:$0xff]  ;;  %v1377_v35 = vld [vmem:[#allocation5 + $0x60] sm:$0xff]  ;;  %s713_s12 = sshll.u32 %s1277_s11, 4  ;;  %s714_s12 = int_to_ptr.vmem [resolvable:$true] %s713_s12 }
  0x2b   :  { %v1345_v18 = vpack.c.bf16 %v81_v15, %v78_v14  ;;  %v93_v25 = vand.u32 4294901760, %v1351_v22  ;;  %v1363_v28 = vld [vmem:[#allocation5 + $0x58] sm:$0xff]  ;;  %v1367_v30 = vand.u32 4294901760, %v41_v26  ;;  %v1369_v31 = vsub.f32 %v43_v3, %v69_v6  ;;  %v1381_v36 = vld [vmem:[#allocation5 + $0x68] sm:$0xff]  ;;  %v1400_v43 = vld [vmem:[#allocation5 + $0x70] sm:$0xff]  ;;  %s1242_s13 = scalar_lea.vmem %s714_s12, 128  ;;  %p1247_p3 = scmp.lt.s32.totalorder %s714_s12, %s714_s12 }
  0x2c   :  { %1038 = vmatpush3.bf16.msra.mxu1 %v1335_v12  ;;  %1110 = vmatpush3.bf16.msra.mxu0 %v1335_v12  ;;  %v1355_v23 = vpack.c.bf16 %v87_v20, %v84_v19  ;;  %v96_v33 = vand.u32 4294901760, %v1361_v27  ;;  %v99_v34 = vand.u32 4294901760, %v1363_v28  ;;  %v1383_v37 = vsub.f32 %v44_v4, %v72_v8  ;;  %v1402_v44 = vld [vmem:[#allocation5 + $0x78] sm:$0xff]  ;;  %p1243_p2 = scmp.ne.s32.totalorder %s714_s12, %s1242_s13  ;;  %p1248_p4 = scmp.lt.s32.totalorder %s1242_s13, %s1242_s13 }
  0x2d   :  { %1039 = vmatprep.subr.bf16.mxu1 %v1274_v0  ;;  %1111 = vmatprep.subr.bf16.mxu0 %v1274_v0  ;;  %v1373_v32 = vpack.c.bf16 %v93_v25, %v90_v24  ;;  %v1385_v38 = vsub.f32 %v45_v7, %v75_v9  ;;  %v102_v39 = vand.u32 4294901760, %v1377_v35  ;;  %v1389_v40 = vsub.f32 %v41_v26, %v1367_v30 }
  0x2e   :  { %v1397_v41 = vpack.c.bf16 %v99_v34, %v96_v33  ;;  %v105_v42 = vand.u32 4294901760, %v1381_v36  ;;  %v159_v45 = vand.u32 4294901760, %v1365_v29  ;;  %v166_v46 = vand.u32 4294901760, %v1369_v31  ;;  %p1249_p5 = por %p1248_p4, %p1247_p3 }
  0x2f   :  { %v1408_v47 = vsub.f32 %v46_v10, %v78_v14  ;;  %v1410_v48 = vsub.f32 %v47_v11, %v81_v15  ;;  %v108_v49 = vand.u32 4294901760, %v1400_v43  ;;  %v111_v50 = vand.u32 4294901760, %v1402_v44 }
  0x30   :  { %1041 = vmatpush3.bf16.msra.mxu1 %v1339_v13  ;;  %1113 = vmatpush3.bf16.msra.mxu0 %v1339_v13  ;;  %v148_v51 = vand.u32 4294901760, %v1389_v40  ;;  %v173_v52 = vand.u32 4294901760, %v1383_v37  ;;  %v1422_v53 = vpack.c.bf16 %v105_v42, %v102_v39  ;;  %v160_v54 = vsub.f32 %v1365_v29, %v159_v45  ;;  %p1250_p6 = pnand %p1249_p5, %p1243_p2 }
  0x31   :  { %1042 = vmatprep.subr.bf16.mxu1 %v1274_v0  ;;  %1114 = vmatprep.subr.bf16.mxu0 %v1274_v0  ;;  %v167_v55 = vsub.f32 %v1369_v31, %v166_v46  ;;  %v180_v56 = vand.u32 4294901760, %v1385_v38  ;;  %v1429_v57 = vsub.f32 %v48_v16, %v84_v19  ;;  %v1431_v58 = vsub.f32 %v49_v17, %v87_v20 }
  0x32   :  { %v149_v59 = vsub.f32 %v1389_v40, %v148_v51  ;;  %v174_v60 = vsub.f32 %v1383_v37, %v173_v52  ;;  %v187_v61 = vand.u32 4294901760, %v1408_v47  ;;  %v194_v62 = vand.u32 4294901760, %v1410_v48 }
  0x33   :  { %v1443_v63 = vpack.c.bf16 %v111_v50, %v108_v49  ;;  %v161_v2 = vand.u32 4294901760, %v160_v54  ;;  %v168_v3 = vand.u32 4294901760, %v167_v55  ;;  %v181_v4 = vsub.f32 %v1385_v38, %v180_v56 }
  0x34   :  { %1044 = vmatpush3.bf16.msra.mxu1 %v1345_v18  ;;  %1116 = vmatpush3.bf16.msra.mxu0 %v1345_v18  ;;  %v1449_v5 = vsub.f32 %v1349_v21, %v90_v24  ;;  %v1452_v6 = vsub.f32 %v1351_v22, %v93_v25  ;;  %v1133_v7 = vpack.c.bf16 %v166_v46, %v159_v45  ;;  %v150_v8 = vand.u32 4294901760, %v149_v59 }
  0x35   :  { %1045 = vmatprep.subr.bf16.mxu1 %v1274_v0  ;;  %1117 = vmatprep.subr.bf16.mxu0 %v1274_v0  ;;  %v175_v9 = vand.u32 4294901760, %v174_v60  ;;  %v188_v10 = vsub.f32 %v1408_v47, %v187_v61  ;;  %v195_v11 = vsub.f32 %v1410_v48, %v194_v62  ;;  %v1061_v14 = vpack.c.bf16 %v168_v3, %v161_v2 }
  0x36   :  { %v182_v15 = vand.u32 4294901760, %v181_v4  ;;  %v201_v16 = vand.u32 4294901760, %v1429_v57  ;;  %v208_v17 = vand.u32 4294901760, %v1431_v58  ;;  %v1465_v19 = vsub.f32 %v1361_v27, %v96_v33 }
  0x37   :  { %v1470_v20 = vsub.f32 %v1363_v28, %v99_v34  ;;  %v1136_v21 = vpack.c.bf16 %v180_v56, %v173_v52  ;;  %v189_v22 = vand.u32 4294901760, %v188_v10  ;;  %v196_v24 = vand.u32 4294901760, %v195_v11 }
  0x38   :  { %1047 = vmatpush3.bf16.msra.mxu1 %v1355_v23  ;;  %1119 = vmatpush3.bf16.msra.mxu0 %v1355_v23  ;;  %v215_v25 = vand.u32 4294901760, %v1449_v5  ;;  %v1064_v26 = vpack.c.bf16 %v182_v15, %v175_v9  ;;  %v202_v45 = vsub.f32 %v1429_v57, %v201_v16  ;;  %v209_v27 = vsub.f32 %v1431_v58, %v208_v17 }
  0x39   :  { %1048 = vmatprep.subr.bf16.mxu1 %v1274_v0  ;;  %1120 = vmatprep.subr.bf16.mxu0 %v1274_v0  ;;  %v222_v33 = vand.u32 4294901760, %v1452_v6  ;;  %v1481_v28 = vsub.f32 %v1377_v35, %v102_v39  ;;  %v1486_v34 = vsub.f32 %v1381_v36, %v105_v42  ;;  %v1067_v46 = vpack.c.bf16 %v196_v24, %v189_v22 }
  0x3a   :  { %v216_v52 = vsub.f32 %v1449_v5, %v215_v25  ;;  %v229_v54 = vand.u32 4294901760, %v1465_v19  ;;  %v203_v35 = vand.u32 4294901760, %v202_v45  ;;  %v210_v39 = vand.u32 4294901760, %v209_v27 }
  0x3b   :  { %v223_v55 = vsub.f32 %v1452_v6, %v222_v33  ;;  %v236_v36 = vand.u32 4294901760, %v1470_v20  ;;  %v1501_v42 = vsub.f32 %v1400_v43, %v108_v49  ;;  %v1506_v56 = vsub.f32 %v1402_v44, %v111_v50 }
  0x3c   :  { %1050 = vmatpush3.bf16.msra.mxu1 %v1373_v32  ;;  %1122 = vmatpush3.bf16.msra.mxu0 %v1373_v32  ;;  %v1142_v59 = vpack.c.bf16 %v208_v17, %v201_v16  ;;  %v217_v60 = vand.u32 4294901760, %v216_v52  ;;  %v1070_v2 = vpack.c.bf16 %v210_v39, %v203_v35  ;;  %v250_v43 = vand.u32 4294901760, %v1486_v34 }
  0x3d   :  { %1051 = vmatprep.subr.bf16.mxu1 %v1274_v0  ;;  %1123 = vmatprep.subr.bf16.mxu0 %v1274_v0  ;;  %v224_v3 = vand.u32 4294901760, %v223_v55  ;;  %v237_v4 = vsub.f32 %v1470_v20, %v236_v36  ;;  %v1145_v44 = vpack.c.bf16 %v222_v33, %v215_v25  ;;  %v264_v11 = vand.u32 4294901760, %v1506_v56 }
  0x3e   :  { %v251_v10 = vsub.f32 %v1486_v34, %v250_v43 }
  0x3f   :  { %v238_v9 = vand.u32 4294901760, %v237_v4  ;;  %v265_v22 = vsub.f32 %v1506_v56, %v264_v11 }
  0x40   :  { %1053 = vmatpush3.bf16.msra.mxu1 %v1397_v41  ;;  %1125 = vmatpush3.bf16.msra.mxu0 %v1397_v41  ;;  %v252_v17 = vand.u32 4294901760, %v251_v10 }
  0x41   :  { %1054 = vmatprep.subr.bf16.mxu1 %v1274_v0  ;;  %1126 = vmatprep.subr.bf16.mxu0 %v1274_v0  ;;  %v266_v45 = vand.u32 4294901760, %v265_v22 }
  0x44   :  { %1056 = vmatpush3.bf16.msra.mxu1 %v1422_v53  ;;  %1128 = vmatpush3.bf16.msra.mxu0 %v1422_v53 }
  0x45   :  { %1057 = vmatprep.subr.bf16.mxu1 %v1274_v0  ;;  %1129 = vmatprep.subr.bf16.mxu0 %v1274_v0 }
  0x48   :  { %1059 = vmatpush3.bf16.msra.mxu1 %v1443_v63  ;;  %1131 = vmatpush3.bf16.msra.mxu0 %v1443_v63 }
  0x49   :  { %1060 = vmatprep.subr.bf16.mxu1 %v1274_v0  ;;  %1132 = vmatprep.subr.bf16.mxu0 %v1274_v0 }
  0x4b   :  { %859 = vmatmul.mubr.f32.vlgmr.msra.gmra.mrb[0].mxu1 %v150_v8  ;;  %964 = vmatmul.mubr.f32.vlgmr.msra.gmra.mrb[0].mxu0 %v148_v51  ;;  %v1139_v51 = vpack.c.bf16 %v194_v62, %v187_v61  ;;  %v230_v61 = vsub.f32 %v1465_v19, %v229_v54  ;;  %v243_v62 = vand.u32 4294901760, %v1481_v28  ;;  %v1073_v8 = vpack.c.bf16 %v224_v3, %v217_v60 }
  0x4c   :  { %1062 = vmatpush3.bf16.msra.mxu1 %v1061_v14  ;;  %1134 = vmatpush3.bf16.msra.mxu0 %v1133_v7  ;;  %v257_v7 = vand.u32 4294901760, %v1501_v42  ;;  %v1148_v14 = vpack.c.bf16 %v236_v36, %v229_v54 }
  0x4d   :  { %1063 = vmatprep.subr.bf16.mxu1 %v1274_v0  ;;  %1135 = vmatprep.subr.bf16.mxu0 %v1274_v0  ;;  %v231_v49 = vand.u32 4294901760, %v230_v61  ;;  %v244_v50 = vsub.f32 %v1481_v28, %v243_v62  ;;  %v1151_v25 = vpack.c.bf16 %v250_v43, %v243_v62 }
  0x4e   :  { %893 = vmatprep.mubr.msk.f32.mxu1 %vm1275_vm0, %v1276_v1  ;;  %998 = vmatprep.mubr.msk.f32.mxu0 %vm1275_vm0, %v1276_v1  ;;  %v1154_v33 = vpack.c.bf16 %v264_v11, %v257_v7 }
  0x4f   :  { %v245_v15 = vand.u32 4294901760, %v244_v50  ;;  %v1076_v16 = vpack.c.bf16 %v238_v9, %v231_v49 }
  0x50   :  { %1065 = vmatpush3.bf16.msra.mxu1 %v1064_v26  ;;  %1137 = vmatpush3.bf16.msra.mxu0 %v1136_v21  ;;  %v258_v21 = vsub.f32 %v1501_v42, %v257_v7 }
  0x51   :  { %1066 = vmatprep.subr.bf16.mxu1 %v1274_v0  ;;  %1138 = vmatprep.subr.bf16.mxu0 %v1274_v0  ;;  %v1079_v24 = vpack.c.bf16 %v252_v17, %v245_v15 }
  0x52   :  { %v259_v26 = vand.u32 4294901760, %v258_v21 }
  0x54   :  { %1068 = vmatpush3.bf16.msra.mxu1 %v1067_v46  ;;  %1140 = vmatpush3.bf16.msra.mxu0 %v1139_v51  ;;  %v1082_v27 = vpack.c.bf16 %v266_v45, %v259_v26  ;;  %v1085_v46 = vpack.c.bf16 %v1369_v31, %v1365_v29  ;;  %v1088_v51 = vpack.c.bf16 %v1385_v38, %v1383_v37  ;;  %v723_v31 = vld [vmem:[%s1593_s2] ss:$0 sm:$0xff] }
  0x55   :  { %1069 = vmatprep.subr.bf16.mxu1 %v1274_v0  ;;  %1141 = vmatprep.subr.bf16.mxu0 %v1274_v0  ;;  %v1091_v29 = vpack.c.bf16 %v1410_v48, %v1408_v47 }
  0x58   :  { %1071 = vmatpush3.bf16.msra.mxu1 %v1070_v2  ;;  %1143 = vmatpush3.bf16.msra.mxu0 %v1142_v59 }
  0x59   :  { %1072 = vmatprep.subr.bf16.mxu1 %v1274_v0  ;;  %1144 = vmatprep.subr.bf16.mxu0 %v1274_v0 }
  0x5c   :  { %1074 = vmatpush3.bf16.msra.mxu1 %v1073_v8  ;;  %1146 = vmatpush3.bf16.msra.mxu0 %v1145_v44 }
  0x5d   :  { %1075 = vmatprep.subr.bf16.mxu1 %v1274_v0  ;;  %1147 = vmatprep.subr.bf16.mxu0 %v1274_v0 }
  0x60   :  { %1077 = vmatpush3.bf16.msra.mxu1 %v1076_v16  ;;  %1149 = vmatpush3.bf16.msra.mxu0 %v1148_v14 }
  0x61   :  { %1078 = vmatprep.subr.bf16.mxu1 %v1274_v0  ;;  %1150 = vmatprep.subr.bf16.mxu0 %v1274_v0 }
  0x64   :  { %1080 = vmatpush3.bf16.msra.mxu1 %v1079_v24  ;;  %1152 = vmatpush3.bf16.msra.mxu0 %v1151_v25 }
  0x65   :  { %1081 = vmatprep.subr.bf16.mxu1 %v1274_v0  ;;  %1153 = vmatprep.subr.bf16.mxu0 %v1274_v0 }
  0x68   :  { %1083 = vmatpush3.bf16.msra.mxu1 %v1082_v27  ;;  %1155 = vmatpush3.bf16.msra.mxu0 %v1154_v33 }
  0x69   :  { %1084 = vmatprep.subr.bf16.mxu1 %v1274_v0  ;;  %1156 = vmatprep.subr.bf16.mxu0 %v1274_v0 }
  0x6b   :  { %894 = vmatmul.mubr.f32.vlgmr.msra.gmra.mrb[0].mxu1 %v1367_v30  ;;  %999 = vmatmul.mubr.f32.vlgmr.msra.gmra.mrb[0].mxu0 %v1367_v30 }
  0x6c   :  { %1086 = vmatpush3.bf16.msra.mxu1 %v1085_v46  ;;  %1158 = vmatpush3.bf16.msra.mxu0 %v1335_v12  ;;  %v1094_v12 = vpack.c.bf16 %v1431_v58, %v1429_v57 }
  0x6d   :  { %1087 = vmatprep.subr.bf16.mxu1 %v1274_v0  ;;  %1159 = vmatprep.subr.bf16.mxu0 %v1274_v0 }
  0x6e   :  { %928 = vmatprep.mubr.msk.f32.mxu1 %vm1275_vm0, %v1276_v1  ;;  %1033 = vmatprep.mubr.msk.f32.mxu0 %vm1275_vm0, %v1276_v1  ;;  %v1097_v1 = vpack.c.bf16 %v1452_v6, %v1449_v5 }
  0x70   :  { %1089 = vmatpush3.bf16.msra.mxu1 %v1088_v51  ;;  %1161 = vmatpush3.bf16.msra.mxu0 %v1339_v13  ;;  %v1100_v13 = vpack.c.bf16 %v1470_v20, %v1465_v19 }
  0x71   :  { %1090 = vmatprep.subr.bf16.mxu1 %v1274_v0  ;;  %1162 = vmatprep.subr.bf16.mxu0 %v1274_v0 }
  0x74   :  { %1092 = vmatpush3.bf16.msra.mxu1 %v1091_v29  ;;  %1164 = vmatpush3.bf16.msra.mxu0 %v1345_v18  ;;  %v1103_v18 = vpack.c.bf16 %v1486_v34, %v1481_v28 }
  0x75   :  { %1093 = vmatprep.subr.bf16.mxu1 %v1274_v0  ;;  %1165 = vmatprep.subr.bf16.mxu0 %v1274_v0 }
  0x78   :  { %1095 = vmatpush3.bf16.msra.mxu1 %v1094_v12  ;;  %1167 = vmatpush3.bf16.msra.mxu0 %v1355_v23  ;;  %v1106_v23 = vpack.c.bf16 %v1506_v56, %v1501_v42 }
  0x79   :  { %1096 = vmatprep.subr.bf16.mxu1 %v1274_v0  ;;  %1168 = vmatprep.subr.bf16.mxu0 %v1274_v0 }
  0x7c   :  { %1098 = vmatpush3.bf16.msra.mxu1 %v1097_v1  ;;  %1170 = vmatpush3.bf16.msra.mxu0 %v1373_v32 }
  0x7d   :  { %1099 = vmatprep.subr.bf16.mxu1 %v1274_v0  ;;  %1171 = vmatprep.subr.bf16.mxu0 %v1274_v0 }
  0x80   :  { %1101 = vmatpush3.bf16.msra.mxu1 %v1100_v13  ;;  %1173 = vmatpush3.bf16.msra.mxu0 %v1397_v41 }
  0x81   :  { %1102 = vmatprep.subr.bf16.mxu1 %v1274_v0  ;;  %1174 = vmatprep.subr.bf16.mxu0 %v1274_v0 }
  0x84   :  { %1104 = vmatpush3.bf16.msra.mxu1 %v1103_v18  ;;  %1176 = vmatpush3.bf16.msra.mxu0 %v1422_v53 }
  0x85   :  { %1105 = vmatprep.subr.bf16.mxu1 %v1274_v0  ;;  %1177 = vmatprep.subr.bf16.mxu0 %v1274_v0 }
  0x88   :  { %1107 = vmatpush3.bf16.msra.mxu1 %v1106_v23  ;;  %1179 = vmatpush3.bf16.msra.mxu0 %v1443_v63 }
  0x8b   :  { %929 = vmatmul.mubr.f32.vlgmr.msra.gmra.mrb[0].mxu1 %v1389_v40  ;;  %1034 = vmatmul.mubr.f32.vlgmr.msra.gmra.mrb[0].mxu0 %v1367_v30 }
 0x15e   :  { %v407_v32 = vpop.f32.mrb[0].mxu1  ;;  %v702_v37 = vpop.f32.mrb[0].mxu0 }
 0x15f   :  { %v1180_v38 = vadd.f32 %v723_v31, %v407_v32  ;;  %v930_v41 = vpop.f32.mrb[1].mxu1  ;;  %v1035_v47 = vpop.f32.mrb[1].mxu0 }
 0x161   :  { %v1181_v48 = vadd.f32 %v1180_v38, %v702_v37 }
 0x163   :  { %706 = vst [vmem:[#allocation7] sm:$0xff] %v1181_v48 }
 0x164   :  { %1253 = shalt.err (!%p1250_p6)
}
 0x165   :  { %s1254_s2 = scalar_lea.hbm %s1594_s3, 128 }
 0x166   :  { %p1255_p7 = scmp.ne.s32.totalorder %s1594_s3, %s1254_s2  ;;  %p1258_p8 = scmp.lt.u32.totalorder %s1254_s2, %s1594_s3 }
 0x168   :  { %p1260_p9 = pnand %p1258_p8, %p1255_p7 }
 0x16a   :  { %1263 = shalt.err (!%p1260_p9)
}
 0x16b   :  { %716 = dma.vmem_to_hbm [thread:$0]  %s714_s12, 128, %s1594_s3, [#allocation4]  }
 0x16c   :  { %1268 = dma.done.wait [#allocation4], 128  }
 0x16d   :  { %1269 = vsyncadd [#allocation4], 4294967168 }
 0x16e   :  { %720 = vsyncpa [#allocation3], 1 }
 0x16f   :  { %721 = vsyncpa [#allocation6], 1 }
 0x170   :  { %722 = vsyncpa [#allocation4], 1 }

</bundles_post_ra>
